<compile_context>
chip_gen: v5e
topology: v5e:2x2
jax: 0.10.0
libtpu: 0.0.40
codegen_flags: <defaults>
</compile_context>

<pallas_src>
import functools
import math

import jax
import jax.numpy as jnp
from jax import lax
from jax.experimental import pallas as pl
from jax.experimental.pallas import tpu as pltpu


_LANE = 128
_MAX_PACK_WIDTH = 512                  # cap packed super-row width (mask <= 1 MiB, bounded MXU cost)
_TARGET_BLOCK_BYTES = 1 << 20          # ~1 MiB input blocks reach ~85% of HBM roofline
_VMEM_BLOCK_BUDGET = 8 * 1024 * 1024   # dbl-buffered in/out blocks + f32 temporaries per step
_VMEM_LIMIT = 32 * 1024 * 1024         # safe on v5e/v6e (128 MiB) and v7x (64 MiB physical)
_TARGET_GRID_STEPS = 32                # keep both v7x TCs fed; amortize ~0.35us/step overhead


def _round_up(x, m):
    return (x + m - 1) // m * m


def _ln_kernel_plain(x_ref, w_ref, b_ref, o_ref, *, eps, n):
    """Per-row LayerNormONNX; reduce over the whole (lane) axis."""
    x = x_ref[...].astype(jnp.float32)                      # (TR, W)
    mean = jnp.mean(x, axis=-1, keepdims=True)
    c = x - mean
    # n == 1 -> 0/0 = nan, matching torch's unbiased-variance behavior.
    inv_nm1 = (1.0 / (n - 1)) if n > 1 else float("inf")
    var = jnp.sum(c * c, axis=-1, keepdims=True) * inv_nm1
    inv = lax.rsqrt(var + eps)                              # EUP slot, not a VPU divide
    o_ref[...] = (c * inv * w_ref[...].astype(jnp.float32)
                  + b_ref[...].astype(jnp.float32)).astype(o_ref.dtype)


def _ln_kernel_packed(x_ref, w_ref, b_ref, m_ref, o_ref, *, eps, seg):
    """g rows packed per lane-dense super-row; per-segment reduce is a
    block-diagonal matmul on the otherwise-idle MXU.  `m_ref` holds the
    precomputed 0/1 mask (constant, resident in VMEM)."""
    x = x_ref[...].astype(jnp.float32)                      # (TR, W)
    m = m_ref[...]                                          # (W, W) constant
    mean = jnp.dot(x, m, preferred_element_type=jnp.float32) * (1.0 / seg)
    c = x - mean
    var = jnp.dot(c * c, m, preferred_element_type=jnp.float32) * (1.0 / (seg - 1))
    inv = lax.rsqrt(var + eps)
    o_ref[...] = (c * inv * w_ref[...].astype(jnp.float32)
                  + b_ref[...].astype(jnp.float32)).astype(o_ref.dtype)


def layer_norm_onnx(x, weight, bias, *, eps=1e-5):
    """LayerNormONNX forward. x: (..., H); weight, bias: (H,)."""
    orig_shape = x.shape
    hidden = orig_shape[-1]
    assert weight.shape == (hidden,) and bias.shape == (hidden,)
    rows = math.prod(orig_shape[:-1])

    # Lane-pack g rows into one lane-dense super-row when hidden < 128 so every
    # load/store uses full 128-lane vregs (biggest measured lever).  Generalized
    # to hidden values that don't divide 128 via lcm, capped for mask/MXU cost.
    g = 1
    if 2 <= hidden < _LANE:
        cand = math.lcm(hidden, _LANE) // hidden
        if cand * hidden <= _MAX_PACK_WIDTH:
            g = cand

    width = g * hidden
    x_flat = x.reshape(rows, hidden)

    # Pad rows to a multiple of g so the packed path always triggers; padded
    # rows are computed (benign: var + eps > 0) and sliced away afterwards.
    pad = (-rows) % g
    if pad:
        x_flat = jnp.concatenate(
            [x_flat, jnp.zeros((pad, hidden), x_flat.dtype)], axis=0)
    packed_rows = (rows + pad) // g
    x2 = x_flat.reshape(packed_rows, width)

    if g > 1:
        w2 = jnp.tile(weight, g).reshape(1, width)
        b2 = jnp.tile(bias, g).reshape(1, width)
        # Constant block-diagonal 0/1 mask, built once outside the kernel.
        mask = jnp.kron(jnp.eye(g, dtype=jnp.float32),
                        jnp.ones((hidden, hidden), jnp.float32))
    else:
        w2 = weight.reshape(1, width)
        b2 = bias.reshape(1, width)
        mask = None

    itemsize = x2.dtype.itemsize
    sublane = {4: 8, 2: 16, 1: 32}.get(itemsize, 8)

    # Tile sizing: ~1 MiB input blocks, VMEM budget including the f32
    # intermediates (x upcast, centered, centered^2, result), and >= ~32 grid
    # steps when there is enough work (v7x 2-TC sharding + pipeline overlap).
    per_row_block = 2 * 2 * width * itemsize        # dbl-buffered in + out blocks
    per_row_temps = 4 * width * 4                   # f32 temporaries in the body
    max_tr = max(sublane,
                 (_VMEM_BLOCK_BUDGET // (per_row_block + per_row_temps))
                 // sublane * sublane)
    hard_cap = max(sublane,
                   (_TARGET_BLOCK_BYTES // (width * itemsize)) // sublane * sublane)
    if packed_rows <= sublane:
        tr = packed_rows                            # full-dim block is always legal
    else:
        want = _round_up(pl.cdiv(packed_rows, _TARGET_GRID_STEPS), sublane)
        tr = max(sublane, min(max_tr, hard_cap, want))
    grid = (pl.cdiv(packed_rows, tr),)              # partial last block is masked

    if g > 1:
        kernel = functools.partial(_ln_kernel_packed, eps=eps, seg=hidden)
        in_specs = [
            pl.BlockSpec((tr, width), lambda i: (i, 0)),
            pl.BlockSpec((1, width), lambda i: (0, 0)),       # weight: resident
            pl.BlockSpec((1, width), lambda i: (0, 0)),       # bias:   resident
            pl.BlockSpec((width, width), lambda i: (0, 0)),   # mask:   resident
        ]
        inputs = (x2, w2, b2, mask)
    else:
        kernel = functools.partial(_ln_kernel_plain, eps=eps, n=hidden)
        in_specs = [
            pl.BlockSpec((tr, width), lambda i: (i, 0)),
            pl.BlockSpec((1, width), lambda i: (0, 0)),
            pl.BlockSpec((1, width), lambda i: (0, 0)),
        ]
        inputs = (x2, w2, b2)

    out = pl.pallas_call(
        kernel,
        out_shape=jax.ShapeDtypeStruct((packed_rows, width), x.dtype),
        grid_spec=pltpu.PrefetchScalarGridSpec(
            num_scalar_prefetch=0,
            grid=grid,
            in_specs=in_specs,
            out_specs=pl.BlockSpec((tr, width), lambda i: (i, 0)),
        ),
        compiler_params=pltpu.CompilerParams(
            dimension_semantics=("parallel",),
            vmem_limit_bytes=_VMEM_LIMIT,
        ),
    )(*inputs)

    out = out.reshape(packed_rows * g, hidden)
    if pad:
        out = out[:rows]
    return out.reshape(orig_shape)


def _reference(x, weight, bias, eps=1e-5):
    xf = x.astype(jnp.float32)
    mean = jnp.mean(xf, axis=-1, keepdims=True)
    var = jnp.sum((xf - mean) ** 2, axis=-1) / (xf.shape[-1] - 1)
    norm = (xf - mean) / jnp.sqrt(var[..., None] + eps)
    return (norm * weight + bias).astype(x.dtype)


if __name__ == "__main__":
    key = jax.random.PRNGKey(0)
    keys = jax.random.split(key, 9)

    # Case 1: hidden = 32 < 128 -> lane-packed path (g = 4, lane-dense stores).
    batch, seq, hidden = 2, 8, 32
    x = jax.random.normal(keys[0], (batch, seq, hidden), dtype=jnp.float32)
    w = jax.random.normal(keys[1], (hidden,), dtype=jnp.float32)
    b = jax.random.normal(keys[2], (hidden,), dtype=jnp.float32)
    y = jax.block_until_ready(layer_norm_onnx(x, w, b, eps=1e-5))
    y_ref = _reference(x, w, b, eps=1e-5)
    assert y.shape == x.shape and y.dtype == x.dtype
    assert jnp.allclose(y, y_ref, atol=1e-5, rtol=1e-5)

    # Case 2: hidden = 256 >= 128 with a row count that does not divide the
    # tile -> plain path, cdiv grid with a masked partial last block.
    batch2, seq2, hidden2 = 3, 5, 256
    xb = jax.random.normal(keys[3], (batch2, seq2, hidden2), dtype=jnp.float32)
    wb = jax.random.normal(keys[4], (hidden2,), dtype=jnp.float32)
    bb = jax.random.normal(keys[5], (hidden2,), dtype=jnp.float32)
    yb = jax.block_until_ready(layer_norm_onnx(xb, wb, bb, eps=1e-5))
    yb_ref = _reference(xb, wb, bb, eps=1e-5)
    assert yb.shape == xb.shape and yb.dtype == xb.dtype
    assert jnp.allclose(yb, yb_ref, atol=1e-5, rtol=1e-5)

    # Case 3: hidden = 96 (does not divide 128) and rows % g != 0
    # -> lcm packing (g = 4, width = 384) with row padding.
    batch3, seq3, hidden3 = 3, 3, 96
    xc = jax.random.normal(keys[6], (batch3, seq3, hidden3), dtype=jnp.float32)
    wc = jax.random.normal(keys[7], (hidden3,), dtype=jnp.float32)
    bc = jax.random.normal(keys[8], (hidden3,), dtype=jnp.float32)
    yc = jax.block_until_ready(layer_norm_onnx(xc, wc, bc, eps=1e-5))
    yc_ref = _reference(xc, wc, bc, eps=1e-5)
    assert yc.shape == xc.shape and yc.dtype == xc.dtype
    assert jnp.allclose(yc, yc_ref, atol=1e-5, rtol=1e-5)

    print("KERNEL_OK")
</pallas_src>

<mosaic_0001>
module attributes {stable_mosaic.version = 11 : i64} {
  func.func @_ln_kernel_packed(%arg0: i32, %arg1: memref<4x128xf32, #tpu.memory_space<vmem>>, %arg2: memref<1x128xf32, #tpu.memory_space<vmem>>, %arg3: memref<1x128xf32, #tpu.memory_space<vmem>>, %arg4: memref<128x128xf32, #tpu.memory_space<vmem>>, %arg5: memref<4x128xf32, #tpu.memory_space<vmem>>) attributes {dimension_semantics = [#tpu.dimension_semantics<parallel>], iteration_bounds = array<i64: 1>, scalar_prefetch = 0 : i64, scratch_operands = 0 : i64, tpu.core_type = #tpu.core_type<tc>, window_params = [{transform_indices = @transform_0, window_bounds = array<i64: 4, 128>}, {pipeline_mode = #tpu.pipeline_mode<synchronous>, transform_indices = @transform_1, window_bounds = array<i64: 1, 128>}, {pipeline_mode = #tpu.pipeline_mode<synchronous>, transform_indices = @transform_2, window_bounds = array<i64: 1, 128>}, {pipeline_mode = #tpu.pipeline_mode<synchronous>, transform_indices = @transform_3, window_bounds = array<i64: 128, 128>}, {transform_indices = @transform_4, window_bounds = array<i64: 4, 128>}]} {
    %c0 = arith.constant 0 : index
    %c0_0 = arith.constant 0 : index
    %0 = vector.load %arg1[%c0, %c0_0] : memref<4x128xf32, #tpu.memory_space<vmem>>, vector<4x128xf32>
    %c0_1 = arith.constant 0 : index
    %c0_2 = arith.constant 0 : index
    %1 = vector.load %arg4[%c0_1, %c0_2] : memref<128x128xf32, #tpu.memory_space<vmem>>, vector<128x128xf32>
    %cst = arith.constant dense<0.000000e+00> : vector<4x128xf32>
    %2 = tpu.matmul %0, %1, %cst {dimension_numbers = #tpu.dot_dimension_numbers<[1], [0], [0], [1], [0, 0, 1, 1], [], []>} : vector<4x128xf32>, vector<128x128xf32>, vector<4x128xf32> -> vector<4x128xf32>
    %cst_3 = arith.constant 3.125000e-02 : f32
    %3 = vector.broadcast %cst_3 : f32 to vector<4x128xf32>
    %4 = arith.mulf %2, %3 : vector<4x128xf32>
    %5 = arith.subf %0, %4 : vector<4x128xf32>
    %6 = arith.mulf %5, %5 : vector<4x128xf32>
    %cst_4 = arith.constant dense<0.000000e+00> : vector<4x128xf32>
    %7 = tpu.matmul %6, %1, %cst_4 {dimension_numbers = #tpu.dot_dimension_numbers<[1], [0], [0], [1], [0, 0, 1, 1], [], []>} : vector<4x128xf32>, vector<128x128xf32>, vector<4x128xf32> -> vector<4x128xf32>
    %cst_5 = arith.constant 0.0322580636 : f32
    %8 = vector.broadcast %cst_5 : f32 to vector<4x128xf32>
    %9 = arith.mulf %7, %8 : vector<4x128xf32>
    %cst_6 = arith.constant 9.99999974E-6 : f32
    %10 = vector.broadcast %cst_6 : f32 to vector<4x128xf32>
    %11 = arith.addf %9, %10 : vector<4x128xf32>
    %12 = math.rsqrt %11 : vector<4x128xf32>
    %13 = arith.mulf %5, %12 : vector<4x128xf32>
    %c0_7 = arith.constant 0 : index
    %c0_8 = arith.constant 0 : index
    %14 = vector.load %arg2[%c0_7, %c0_8] : memref<1x128xf32, #tpu.memory_space<vmem>>, vector<1x128xf32>
    %15 = vector.broadcast %14 : vector<1x128xf32> to vector<4x128xf32>
    %16 = arith.mulf %13, %15 : vector<4x128xf32>
    %c0_9 = arith.constant 0 : index
    %c0_10 = arith.constant 0 : index
    %17 = vector.load %arg3[%c0_9, %c0_10] : memref<1x128xf32, #tpu.memory_space<vmem>>, vector<1x128xf32>
    %18 = vector.broadcast %17 : vector<1x128xf32> to vector<4x128xf32>
    %19 = arith.addf %16, %18 : vector<4x128xf32>
    %c0_11 = arith.constant 0 : index
    %c0_12 = arith.constant 0 : index
    %20 = vector.load %arg5[%c0_11, %c0_12] : memref<4x128xf32, #tpu.memory_space<vmem>>, vector<4x128xf32>
    tpu.vector_store %arg5[%c0_11, %c0_12], %19 {strides = array<i32>} : memref<4x128xf32, #tpu.memory_space<vmem>>, vector<4x128xf32>,
    return
  }
  func.func @transform_0(%arg0: i32) -> (i32, i32) {
    %c0_i32 = arith.constant 0 : i32
    %c0_i32_0 = arith.constant 0 : i32
    return %arg0, %c0_i32 : i32, i32
  }
  func.func @transform_1(%arg0: i32) -> (i32, i32) {
    %c0_i32 = arith.constant 0 : i32
    %c0_i32_0 = arith.constant 0 : i32
    %c0_i32_1 = arith.constant 0 : i32
    return %c0_i32, %c0_i32_0 : i32, i32
  }
  func.func @transform_2(%arg0: i32) -> (i32, i32) {
    %c0_i32 = arith.constant 0 : i32
    %c0_i32_0 = arith.constant 0 : i32
    %c0_i32_1 = arith.constant 0 : i32
    return %c0_i32, %c0_i32_0 : i32, i32
  }
  func.func @transform_3(%arg0: i32) -> (i32, i32) {
    %c0_i32 = arith.constant 0 : i32
    %c0_i32_0 = arith.constant 0 : i32
    %c0_i32_1 = arith.constant 0 : i32
    return %c0_i32, %c0_i32_0 : i32, i32
  }
  func.func @transform_4(%arg0: i32) -> (i32, i32) {
    %c0_i32 = arith.constant 0 : i32
    %c0_i32_0 = arith.constant 0 : i32
    return %arg0, %c0_i32 : i32, i32
  }
}

</mosaic_0001>

<bundles_post_ra>
// kernel: tpu_custom_call.1
= control target key start
LH: loop header
LB: loop body
LE: loop exit
PB: predicated region body
PF: predicated region fallthrough
CT: control target
= control target key end

     0   :  { %9 = vsyncpa [#allocation3], 0  ;;  %s321_s0 = inlined_call_operand.hbm [shape: f32[4,128], index: 0, kind: input, shape index: {}]   ;;  %s322_s1 = inlined_call_operand.hbm [shape: f32[1,128], index: 1, kind: input, shape index: {}]   ;;  %s323_s2 = inlined_call_operand.vmem [shape: f32[1,128], index: 2, kind: input, shape index: {}]   ;;  %s324_s3 = inlined_call_operand.hbm [shape: f32[128,128], index: 3, kind: input, shape index: {}]   ;;  %s325_s4 = inlined_call_operand.hbm [shape: f32[4,128], index: 4, kind: output, shape index: {}]  }
   0x1   :  { %10 = vsyncpa [#allocation6], 0  ;;  %s28_s17 = sshll.u32 %s322_s1, 4  ;;  %s29_s17 = int_to_ptr.hbm [resolvable:$true] %s28_s17 }
   0x2   :  { %11 = vsyncpa [#allocation4], 0  ;;  %s275_s18 = smov [#allocation5]   ;;  %s17_s22 = sshll.u32 %s321_s0, 4  ;;  %s18_s22 = int_to_ptr.hbm [resolvable:$true] %s17_s22 }
   0x3   :  { %s30_s19 = sshll.u32 %s275_s18, 4  ;;  %s276_s23 = smov [#allocation2]   ;;  %s31_s19 = int_to_ptr.vmem [resolvable:$true] %s30_s19 }
   0x4   :  { %33 = dma.hbm_to_vmem [thread:$0]  %s29_s17, 16, %s31_s19, [#allocation6]  }
   0x5   :  { %s19_s24 = sshll.u32 %s276_s23, 4  ;;  %s40_s27 = sshll.u32 %s324_s3, 4  ;;  %s20_s24 = int_to_ptr.vmem [resolvable:$true] %s19_s24  ;;  %s41_s27 = int_to_ptr.hbm [resolvable:$true] %s40_s27 }
   0x6   :  { %22 = dma.hbm_to_vmem [thread:$0]  %s18_s22, 64, %s20_s24, [#allocation3]  }
   0x7   :  { %s277_s1 = smov [#allocation7]   ;;  %s278_s29 = smov 128  }
   0x8   :  { %s42_s28 = sshll.u32 %s277_s1, 4  ;;  %s279_s30 = smov 8   ;;  %s43_s28 = int_to_ptr.vmem [resolvable:$true] %s42_s28 }
   0x9   :  { %48 = dma.hbm_to_vmem [thread:$0]  %s41_s27, 2048, %s43_s28, [#allocation6], %s278_s29, %s278_s29, %s279_s30  }
   0xa   :  { %269 = dma.done.wait [#allocation3], 64  }
   0xb   :  { %270 = vsyncadd [#allocation3], 4294967232 }
   0xc   :  { %271 = dma.done.wait [#allocation6], 2064  }
   0xd   :  { %272 = vsyncadd [#allocation6], 4294965232  ;;  %v77_v0 = vld [vmem:[#allocation7 + $0x78] sm:$0xff]  ;;  %v76_v1 = vld [vmem:[#allocation7 + $0x70] sm:$0xff]  ;;  %s280_s5 = smov [#allocation8]   ;;  %s152_s9 = sshll.u32 %s325_s4, 4  ;;  %s153_s9 = int_to_ptr.hbm [resolvable:$true] %s152_s9 }
   0xe   :  { %78 = vmatpush.msra.mxu0 %v77_v0  ;;  %101 = vmatpush.msra.mxu1 %v77_v0  ;;  %v75_v2 = vld [vmem:[#allocation7 + $0x68] sm:$0xff]  ;;  %v74_v3 = vld [vmem:[#allocation7 + $0x60] sm:$0xff]  ;;  %v73_v4 = vld [vmem:[#allocation7 + $0x58] sm:$0xff]  ;;  %s150_s6 = sshll.u32 %s280_s5, 4  ;;  %s151_s6 = int_to_ptr.vmem [resolvable:$true] %s150_s6 }
   0xf   :  { %v72_v5 = vld [vmem:[#allocation7 + $0x50] sm:$0xff]  ;;  %v71_v6 = vld [vmem:[#allocation7 + $0x48] sm:$0xff]  ;;  %v70_v7 = vld [vmem:[#allocation7 + $0x40] sm:$0xff] }
  0x10   :  { %79 = vmatpush.msra.mxu0 %v76_v1  ;;  %102 = vmatpush.msra.mxu1 %v76_v1  ;;  %v69_v8 = vld [vmem:[#allocation7 + $0x38] sm:$0xff]  ;;  %v68_v9 = vld [vmem:[#allocation7 + $0x30] sm:$0xff]  ;;  %v67_v10 = vld [vmem:[#allocation7 + $0x28] sm:$0xff] }
  0x11   :  { %v66_v11 = vld [vmem:[#allocation7 + $0x20] sm:$0xff]  ;;  %v65_v12 = vld [vmem:[#allocation7 + $0x18] sm:$0xff]  ;;  %v64_v13 = vld [vmem:[#allocation7 + $0x10] sm:$0xff] }
  0x12   :  { %80 = vmatpush.msra.mxu0 %v75_v2  ;;  %103 = vmatpush.msra.mxu1 %v75_v2  ;;  %v63_v14 = vld [vmem:[#allocation7 + $0x8] sm:$0xff]  ;;  %v62_v15 = vld [vmem:[#allocation7] sm:$0xff]  ;;  %v61_v16 = vld [vmem:[#allocation2] sm:$0xf] }
  0x13   :  { %v169_v30 = vld [vmem:[#allocation5] ss:$0 sm:$0xff]  ;;  %v170_v33 = vld [vmem:[%s323_s2] ss:$0 sm:$0xff] }
  0x14   :  { %81 = vmatpush.msra.mxu0 %v74_v3  ;;  %104 = vmatpush.msra.mxu1 %v74_v3 }
  0x16   :  { %82 = vmatpush.msra.mxu0 %v73_v4  ;;  %105 = vmatpush.msra.mxu1 %v73_v4 }
  0x18   :  { %83 = vmatpush.msra.mxu0 %v72_v5  ;;  %106 = vmatpush.msra.mxu1 %v72_v5 }
  0x1a   :  { %84 = vmatpush.msra.mxu0 %v71_v6  ;;  %107 = vmatpush.msra.mxu1 %v71_v6 }
  0x1c   :  { %85 = vmatpush.msra.mxu0 %v70_v7  ;;  %108 = vmatpush.msra.mxu1 %v70_v7 }
  0x1e   :  { %86 = vmatpush.msra.mxu0 %v69_v8  ;;  %109 = vmatpush.msra.mxu1 %v69_v8 }
  0x20   :  { %87 = vmatpush.msra.mxu0 %v68_v9  ;;  %110 = vmatpush.msra.mxu1 %v68_v9 }
  0x22   :  { %88 = vmatpush.msra.mxu0 %v67_v10  ;;  %111 = vmatpush.msra.mxu1 %v67_v10 }
  0x24   :  { %89 = vmatpush.msra.mxu0 %v66_v11  ;;  %112 = vmatpush.msra.mxu1 %v66_v11 }
  0x26   :  { %90 = vmatpush.msra.mxu0 %v65_v12  ;;  %113 = vmatpush.msra.mxu1 %v65_v12 }
  0x28   :  { %91 = vmatpush.msra.mxu0 %v64_v13  ;;  %114 = vmatpush.msra.mxu1 %v64_v13 }
  0x2a   :  { %92 = vmatpush.msra.mxu0 %v63_v14  ;;  %115 = vmatpush.msra.mxu1 %v63_v14 }
  0x2c   :  { %93 = vmatpush.msra.mxu0 %v62_v15  ;;  %116 = vmatpush.msra.mxu1 %v62_v15 }
  0x2d   :  { %94 = vmatmul.f32.vlgmr.msra.gmra.mxu0 %v61_v16 }
  0xaa   :  { %v95_v17 = vpop.f32.mrf.mxu0 }
  0xab   :  { %v98_v18 = vmul.f32 0.03125, %v95_v17 }
  0xad   :  { %v99_v19 = vsub.f32 %v61_v16, %v98_v18 }
  0xaf   :  { %v100_v20 = vmul.f32 %v99_v19, %v99_v19 }
  0xb1   :  { %117 = vmatmul.f32.vlgmr.msra.gmra.mxu1 %v100_v20 }
 0x12e   :  { %v118_v21 = vpop.f32.mrf.mxu1 }
 0x12f   :  { %v121_v22 = vmul.f32 0.032258064, %v118_v21 }
 0x131   :  { %v122_v23 = vadd.f32 1e-05, %v121_v22 }
 0x133   :  { %171 = vrsqrt.f32 %v122_v23  ;;  %vm129_vm1 = vweird.f32 %v122_v23 }
 0x139   :  { %v172_v24 = vpop.eup %171 }
 0x13a   :  { %v124_v25 = vmul.f32 %v172_v24, %v122_v23  ;;  %vm130_vm0 = vweird.f32 %v172_v24 }
 0x13b   :  { %vm131_vm2 = vmor %vm129_vm1, %vm130_vm0 }
 0x13c   :  { %v125_v26 = vmul.f32 %v172_v24, %v124_v25 }
 0x13e   :  { %v126_v27 = vmul.f32 0.5, %v125_v26 }
 0x140   :  { %v127_v28 = vsub.f32 1.5, %v126_v27 }
 0x142   :  { %v128_v29 = vmul.f32 %v172_v24, %v127_v28 }
 0x144   :  { %v132_v31 = vsel %vm131_vm2, %v172_v24, %v128_v29 }
 0x145   :  { %v133_v32 = vmul.f32 %v132_v31, %v99_v19 }
 0x147   :  { %v138_v34 = vmul.f32 %v169_v30, %v133_v32 }
 0x149   :  { %v143_v35 = vadd.f32 %v170_v33, %v138_v34 }
 0x14b   :  { %144 = vst [vmem:[#allocation8] sm:$0xf] %v143_v35 }
 0x14c   :  { %155 = dma.vmem_to_hbm [thread:$0]  %s151_s6, 64, %s153_s9, [#allocation4]  }
 0x14d   :  { %273 = dma.done.wait [#allocation4], 64  }
 0x14e   :  { %274 = vsyncadd [#allocation4], 4294967232 }
 0x14f   :  { %160 = vsyncpa [#allocation3], 1 }
 0x150   :  { %161 = vsyncpa [#allocation6], 1 }
 0x151   :  { %162 = vsyncpa [#allocation4], 1 }

</bundles_post_ra>
